<compile_context>
chip_gen: v7x
topology: tpu7x:2x2x1
jax: 0.10.0
libtpu: 0.0.40
codegen_flags: <defaults>
</compile_context>

<pallas_src>
import jax
import jax.numpy as jnp
from jax.experimental import pallas as pl
from jax.experimental.pallas import tpu as pltpu

INPUT_DIM = 99
PADDED_DIM = 128   # K padded to a full lane width
H1 = 300
H2 = 64
OUT = 1
ROW_ALIGN = 16     # batch-tile multiple: covers f32 (8,128) and bf16 (16,128) sublane tiling


def _round_up(n, m):
    return ((n + m - 1) // m) * m


def _make_mlp_kernel(mxu_dtype):
    def mlp_kernel(x_ref, w1_ref, b1_ref, w2_ref, b2_ref, w3r_ref, b3_ref, o_ref):
        # Layer 1: Linear(128 -> 300) + ReLU   (Dropout(0.3) is identity at inference)
        h1 = jnp.dot(x_ref[...], w1_ref[...], preferred_element_type=jnp.float32)
        h1 = jnp.maximum(h1 + b1_ref[...], 0.0)
        # Layer 2: Linear(300 -> 64) + ReLU    (Dropout(0.3) is identity at inference)
        h2 = jnp.dot(h1.astype(mxu_dtype), w2_ref[...], preferred_element_type=jnp.float32)
        h2 = jnp.maximum(h2 + b2_ref[...], 0.0)
        # Layer 3: Linear(64 -> 1) + Sigmoid.  N=1 would waste >99% of every MXU
        # push, so do it on the VPU (mul) + XLU (64-lane reduce) instead.
        z = jnp.sum(h2 * w3r_ref[...], axis=-1, keepdims=True) + b3_ref[...]
        # exp -> EUP; exact reciprocal keeps eval-mode numerics (approx=True would
        # also go to the EUP but adds ~1e-4 absolute error).
        o_ref[...] = pl.reciprocal(1.0 + jnp.exp(-z), approx=False)
        # NOTE: output kept as (TB, 1); a lane-dense (1, TB) store would need an
        # in-kernel relayout that costs more than this tiny output stream saves.
        # TODO(synk): training-mode Dropout (inverted-dropout masks via
        # pltpu.prng_random_bits) intentionally omitted; forward matches model.eval().
    return mlp_kernel


def _forward(x, params, *, tb=1024, mxu_dtype=jnp.float32):
    w1, b1, w2, b2, w3, b3 = params
    B = x.shape[0]
    assert x.shape[1] == INPUT_DIM

    # ---- wrapper-side layout prep (trace-time XLA ops, outside the kernel) ----
    # K-pad 99 -> 128: zero columns of x / zero rows of W1 contribute nothing.
    x_p = jnp.pad(x, ((0, 0), (0, PADDED_DIM - INPUT_DIM))).astype(mxu_dtype)
    w1_p = jnp.pad(w1, ((0, PADDED_DIM - INPUT_DIM), (0, 0))).astype(mxu_dtype)
    w2_c = w2.astype(mxu_dtype)
    b1_r = b1.reshape(1, H1).astype(jnp.float32)
    b2_r = b2.reshape(1, H2).astype(jnp.float32)
    w3_row = w3.reshape(1, H2).astype(jnp.float32)   # layer 3 as a VPU row
    b3_r = b3.reshape(1, OUT).astype(jnp.float32)

    # ---- batch tiling (TB capped at 1024 -> comfortably inside v7x's 64 MiB VMEM) ----
    tb = _round_up(tb, ROW_ALIGN)
    tb_eff = min(tb, _round_up(B, ROW_ALIGN))
    b_pad = _round_up(B, tb_eff)
    if b_pad != B:
        x_p = jnp.pad(x_p, ((0, b_pad - B), (0, 0)))
    grid = (b_pad // tb_eff,)

    const2 = lambda i: (0, 0)
    in_specs = [
        pl.BlockSpec((tb_eff, PADDED_DIM), lambda i: (i, 0)),  # x: streamed per tile
        pl.BlockSpec((PADDED_DIM, H1), const2),                # W1: VMEM-resident
        pl.BlockSpec((1, H1), const2),                         # b1
        pl.BlockSpec((H1, H2), const2),                        # W2
        pl.BlockSpec((1, H2), const2),                         # b2
        pl.BlockSpec((1, H2), const2),                         # w3 (row form)
        pl.BlockSpec((1, OUT), const2),                        # b3
    ]
    out_specs = pl.BlockSpec((tb_eff, OUT), lambda i: (i, 0))

    itemsize = jnp.dtype(mxu_dtype).itemsize
    cost = pl.CostEstimate(
        flops=2 * b_pad * (PADDED_DIM * H1 + H1 * H2 + H2),
        transcendentals=b_pad,
        bytes_accessed=(b_pad * PADDED_DIM + PADDED_DIM * H1 + H1 * H2) * itemsize
        + (H1 + H2 + H2 + OUT + b_pad * OUT) * 4,
    )

    out = pl.pallas_call(
        _make_mlp_kernel(mxu_dtype),
        out_shape=jax.ShapeDtypeStruct((b_pad, OUT), jnp.float32),
        grid=grid,
        in_specs=in_specs,
        out_specs=out_specs,
        compiler_params=pltpu.CompilerParams(
            dimension_semantics=("parallel",),   # v7x: shard batch tiles across both TCs
        ),
        cost_estimate=cost,
    )(x_p, w1_p, b1_r, w2_c, b2_r, w3_row, b3_r)
    return out[:B]


binary_classifier_forward = jax.jit(_forward, static_argnames=("tb", "mxu_dtype"))


def init_params(key):
    """Deterministic parameter init (Kaiming-uniform-ish, like torch Linear defaults)."""
    ks = jax.random.split(key, 6)

    def lin(kw, kb, fan_in, fan_out):
        bound = 1.0 / jnp.sqrt(fan_in)
        w = jax.random.uniform(kw, (fan_in, fan_out), jnp.float32, -bound, bound)
        b = jax.random.uniform(kb, (1, fan_out), jnp.float32, -bound, bound)
        return w, b

    w1, b1 = lin(ks[0], ks[1], INPUT_DIM, H1)
    w2, b2 = lin(ks[2], ks[3], H1, H2)
    w3, b3 = lin(ks[4], ks[5], H2, OUT)
    return (w1, b1, w2, b2, w3, b3)


def reference_forward(x, params):
    w1, b1, w2, b2, w3, b3 = params
    h1 = jnp.maximum(x @ w1 + b1, 0.0)
    h2 = jnp.maximum(h1 @ w2 + b2, 0.0)
    return jax.nn.sigmoid(h2 @ w3 + b3)


if __name__ == "__main__":
    key = jax.random.PRNGKey(0)
    kx, kb, kp = jax.random.split(key, 3)

    params = init_params(kp)

    # Small deterministic input consistent with the module (batch=8, features=99).
    batch = 8
    x = jax.random.normal(kx, (batch, INPUT_DIM), dtype=jnp.float32)
    ref = reference_forward(x, params)

    # 1) f32 path (exact eval-mode semantics), single tile.
    out = jax.block_until_ready(binary_classifier_forward(x, params))
    assert out.shape == (batch, OUT), out.shape
    assert jnp.allclose(out, ref, atol=1e-5, rtol=1e-5), "f32 mismatch vs pure-JAX reference"

    # 2) Multi-tile grid path (partial last tile exercises batch padding + slicing).
    x_big = jax.random.normal(kb, (200, INPUT_DIM), dtype=jnp.float32)
    ref_big = reference_forward(x_big, params)
    out_big = jax.block_until_ready(binary_classifier_forward(x_big, params, tb=64))
    assert out_big.shape == (200, OUT), out_big.shape
    assert jnp.allclose(out_big, ref_big, atol=1e-5, rtol=1e-5), "tiled mismatch vs reference"

    # 3) bf16-MXU path (memory-bound win on v5e/v6e/v7x); f32 accumulate, looser tol.
    out_bf16 = jax.block_until_ready(
        binary_classifier_forward(x, params, mxu_dtype=jnp.bfloat16))
    assert out_bf16.shape == (batch, OUT), out_bf16.shape
    assert jnp.allclose(out_bf16, ref, atol=2e-2, rtol=2e-2), "bf16 mismatch vs reference"

    print("KERNEL_OK")
</pallas_src>

<mosaic_0001>
module attributes {stable_mosaic.version = 11 : i64} {
  func.func @mlp_kernel(%arg0: i32, %arg1: memref<16x128xf32, #tpu.memory_space<vmem>>, %arg2: memref<128x300xf32, #tpu.memory_space<vmem>>, %arg3: memref<1x300xf32, #tpu.memory_space<vmem>>, %arg4: memref<300x64xf32, #tpu.memory_space<vmem>>, %arg5: memref<1x64xf32, #tpu.memory_space<vmem>>, %arg6: memref<1x64xf32, #tpu.memory_space<vmem>>, %arg7: memref<1x1xf32, #tpu.memory_space<vmem>>, %arg8: memref<16x1xf32, #tpu.memory_space<vmem>>) attributes {dimension_semantics = [#tpu.dimension_semantics<parallel>], iteration_bounds = array<i64: 1>, scalar_prefetch = 0 : i64, scratch_operands = 0 : i64, tpu.core_type = #tpu.core_type<tc>, window_params = [{transform_indices = @transform_0, window_bounds = array<i64: 16, 128>}, {pipeline_mode = #tpu.pipeline_mode<synchronous>, transform_indices = @transform_1, window_bounds = array<i64: 128, 300>}, {pipeline_mode = #tpu.pipeline_mode<synchronous>, transform_indices = @transform_2, window_bounds = array<i64: 1, 300>}, {pipeline_mode = #tpu.pipeline_mode<synchronous>, transform_indices = @transform_3, window_bounds = array<i64: 300, 64>}, {pipeline_mode = #tpu.pipeline_mode<synchronous>, transform_indices = @transform_4, window_bounds = array<i64: 1, 64>}, {pipeline_mode = #tpu.pipeline_mode<synchronous>, transform_indices = @transform_5, window_bounds = array<i64: 1, 64>}, {pipeline_mode = #tpu.pipeline_mode<synchronous>, transform_indices = @transform_6, window_bounds = array<i64: 1, 1>}, {transform_indices = @transform_7, window_bounds = array<i64: 16, 1>}]} {
    %c0 = arith.constant 0 : index
    %c0_0 = arith.constant 0 : index
    %0 = vector.load %arg1[%c0, %c0_0] : memref<16x128xf32, #tpu.memory_space<vmem>>, vector<16x128xf32>
    %c0_1 = arith.constant 0 : index
    %c0_2 = arith.constant 0 : index
    %1 = vector.load %arg2[%c0_1, %c0_2] : memref<128x300xf32, #tpu.memory_space<vmem>>, vector<128x300xf32>
    %cst = arith.constant dense<0.000000e+00> : vector<16x300xf32>
    %2 = tpu.matmul %0, %1, %cst {dimension_numbers = #tpu.dot_dimension_numbers<[1], [0], [0], [1], [0, 0, 1, 1], [], []>} : vector<16x128xf32>, vector<128x300xf32>, vector<16x300xf32> -> vector<16x300xf32>
    %c0_3 = arith.constant 0 : index
    %c0_4 = arith.constant 0 : index
    %3 = vector.load %arg3[%c0_3, %c0_4] : memref<1x300xf32, #tpu.memory_space<vmem>>, vector<1x300xf32>
    %4 = vector.broadcast %3 : vector<1x300xf32> to vector<16x300xf32>
    %5 = arith.addf %2, %4 : vector<16x300xf32>
    %cst_5 = arith.constant 0.000000e+00 : f32
    %6 = vector.broadcast %cst_5 : f32 to vector<16x300xf32>
    %7 = arith.maximumf %5, %6 : vector<16x300xf32>
    %c0_6 = arith.constant 0 : index
    %c0_7 = arith.constant 0 : index
    %8 = vector.load %arg4[%c0_6, %c0_7] : memref<300x64xf32, #tpu.memory_space<vmem>>, vector<300x64xf32>
    %cst_8 = arith.constant dense<0.000000e+00> : vector<16x64xf32>
    %9 = tpu.matmul %7, %8, %cst_8 {dimension_numbers = #tpu.dot_dimension_numbers<[1], [0], [0], [1], [0, 0, 1, 1], [], []>} : vector<16x300xf32>, vector<300x64xf32>, vector<16x64xf32> -> vector<16x64xf32>
    %c0_9 = arith.constant 0 : index
    %c0_10 = arith.constant 0 : index
    %10 = vector.load %arg5[%c0_9, %c0_10] : memref<1x64xf32, #tpu.memory_space<vmem>>, vector<1x64xf32>
    %11 = vector.broadcast %10 : vector<1x64xf32> to vector<16x64xf32>
    %12 = arith.addf %9, %11 : vector<16x64xf32>
    %cst_11 = arith.constant 0.000000e+00 : f32
    %13 = vector.broadcast %cst_11 : f32 to vector<16x64xf32>
    %14 = arith.maximumf %12, %13 : vector<16x64xf32>
    %c0_12 = arith.constant 0 : index
    %c0_13 = arith.constant 0 : index
    %15 = vector.load %arg6[%c0_12, %c0_13] : memref<1x64xf32, #tpu.memory_space<vmem>>, vector<1x64xf32>
    %16 = vector.broadcast %15 : vector<1x64xf32> to vector<16x64xf32>
    %17 = arith.mulf %14, %16 : vector<16x64xf32>
    %cst_14 = arith.constant dense<0.000000e+00> : vector<16xf32>
    %18 = vector.multi_reduction <add>, %17, %cst_14 [1] : vector<16x64xf32> to vector<16xf32>
    %19 = vector.shape_cast %18 : vector<16xf32> to vector<16x1xf32>
    %c0_15 = arith.constant 0 : index
    %c0_16 = arith.constant 0 : index
    %20 = vector.load %arg7[%c0_15, %c0_16] : memref<1x1xf32, #tpu.memory_space<vmem>>, vector<1x1xf32>
    %21 = vector.broadcast %20 : vector<1x1xf32> to vector<16x1xf32>
    %22 = arith.addf %19, %21 : vector<16x1xf32>
    %cst_17 = arith.constant 0.000000e+00 : f32
    %23 = vector.broadcast %cst_17 : f32 to vector<16x1xf32>
    %24 = arith.subf %23, %22 : vector<16x1xf32>
    %25 = math.exp %24 : vector<16x1xf32>
    %cst_18 = arith.constant 1.000000e+00 : f32
    %26 = vector.broadcast %cst_18 : f32 to vector<16x1xf32>
    %27 = arith.addf %26, %25 : vector<16x1xf32>
    %28 = tpu.reciprocal %27 : vector<16x1xf32> -> vector<16x1xf32>
    %c0_19 = arith.constant 0 : index
    %c0_20 = arith.constant 0 : index
    %29 = vector.load %arg8[%c0_19, %c0_20] : memref<16x1xf32, #tpu.memory_space<vmem>>, vector<16x1xf32>
    tpu.vector_store %arg8[%c0_19, %c0_20], %28 {strides = array<i32>} : memref<16x1xf32, #tpu.memory_space<vmem>>, vector<16x1xf32>,
    return
  }
  func.func @transform_0(%arg0: i32) -> (i32, i32) {
    %c0_i32 = arith.constant 0 : i32
    %c0_i32_0 = arith.constant 0 : i32
    return %arg0, %c0_i32 : i32, i32
  }
  func.func @transform_1(%arg0: i32) -> (i32, i32) {
    %c0_i32 = arith.constant 0 : i32
    %c0_i32_0 = arith.constant 0 : i32
    %c0_i32_1 = arith.constant 0 : i32
    return %c0_i32, %c0_i32_0 : i32, i32
  }
  func.func @transform_2(%arg0: i32) -> (i32, i32) {
    %c0_i32 = arith.constant 0 : i32
    %c0_i32_0 = arith.constant 0 : i32
    %c0_i32_1 = arith.constant 0 : i32
    return %c0_i32, %c0_i32_0 : i32, i32
  }
  func.func @transform_3(%arg0: i32) -> (i32, i32) {
    %c0_i32 = arith.constant 0 : i32
    %c0_i32_0 = arith.constant 0 : i32
    %c0_i32_1 = arith.constant 0 : i32
    return %c0_i32, %c0_i32_0 : i32, i32
  }
  func.func @transform_4(%arg0: i32) -> (i32, i32) {
    %c0_i32 = arith.constant 0 : i32
    %c0_i32_0 = arith.constant 0 : i32
    %c0_i32_1 = arith.constant 0 : i32
    return %c0_i32, %c0_i32_0 : i32, i32
  }
  func.func @transform_5(%arg0: i32) -> (i32, i32) {
    %c0_i32 = arith.constant 0 : i32
    %c0_i32_0 = arith.constant 0 : i32
    %c0_i32_1 = arith.constant 0 : i32
    return %c0_i32, %c0_i32_0 : i32, i32
  }
  func.func @transform_6(%arg0: i32) -> (i32, i32) {
    %c0_i32 = arith.constant 0 : i32
    %c0_i32_0 = arith.constant 0 : i32
    %c0_i32_1 = arith.constant 0 : i32
    return %c0_i32, %c0_i32_0 : i32, i32
  }
  func.func @transform_7(%arg0: i32) -> (i32, i32) {
    %c0_i32 = arith.constant 0 : i32
    %c0_i32_0 = arith.constant 0 : i32
    return %arg0, %c0_i32 : i32, i32
  }
}

</mosaic_0001>

<bundles_post_ra>
// kernel: _forward.1
= control target key start
LH: loop header
LB: loop body
LE: loop exit
PB: predicated region body
PF: predicated region fallthrough
CT: control target
= control target key end

     0   :  { %v743_v3 = vmov 0.0   ;;  %vm305_vm0 = vcmask 1043456   ;;  %vm744_vm1 = vmmov 1   ;;  %vm298_vm3 = vcmask 359424   ;;  %s1069_s1 = inlined_call_operand.vmem [shape: f32[128,300], index: 1, kind: input, shape index: {}]   ;;  %s1070_s0 = inlined_call_operand.vmem [shape: f32[16,128], index: 0, kind: input, shape index: {}]   ;;  %s1071_s3 = inlined_call_operand.vmem [shape: f32[300,64], index: 3, kind: input, shape index: {}]   ;;  %s1072_s2 = inlined_call_operand.vmem [shape: f32[1,300], index: 2, kind: input, shape index: {}]   ;;  %s1073_s6 = inlined_call_operand.<no memory space> [shape: f32[1,1], index: 6, kind: input, shape index: {}]   ;;  %s1074_s4 = inlined_call_operand.vmem [shape: f32[1,64], index: 4, kind: input, shape index: {}]   ;;  %s1075_s5 = inlined_call_operand.vmem [shape: f32[1,64], index: 5, kind: input, shape index: {}]   ;;  %s1076_s7 = inlined_call_operand.vmem [shape: f32[16,1], index: 7, kind: output, shape index: {}]  }
   0x1   :  { %v31_v0 = vld [vmem:[%s1069_s1 + $0x8] sm:$0xff]  ;;  %v34_v1 = vld [vmem:[%s1069_s1 + $0x20] sm:$0xff]  ;;  %159 = vmatprep.mubr.f32.mxu0 %v743_v3  ;;  %v33_v5 = vld [vmem:[%s1069_s1 + $0x18] sm:$0xff]  ;;  %vm470_vm4 = vcmask 523264   ;;  %vm496_vm5 = vcmask 7168  }
   0x2   :  { %v30_v2 = vld [vmem:[%s1069_s1] sm:$0xff]  ;;  %v623_v4 = vpack.c.bf16 %v34_v1, %v31_v0  ;;  %v32_v6 = vld [vmem:[%s1069_s1 + $0x10] sm:$0xff]  ;;  %v35_v7 = vld [vmem:[%s1069_s1 + $0x28] sm:$0xff] }
   0x3   :  { %v625_v8 = vpack.c.bf16 %v33_v5, %v30_v2  ;;  %v655_v9 = vpack.c.bf16 %v35_v7, %v32_v6  ;;  %v37_v10 = vld [vmem:[%s1069_s1 + $0x38] sm:$0xff]  ;;  %v40_v11 = vld [vmem:[%s1069_s1 + $0x50] sm:$0xff]  ;;  %v39_v14 = vld [vmem:[%s1069_s1 + $0x48] sm:$0xff] }
   0x4   :  { %v36_v12 = vld [vmem:[%s1069_s1 + $0x30] sm:$0xff]  ;;  %624 = vmatprep.subr.bf16.mxu0 %v623_v4  ;;  %v627_v13 = vpack.c.bf16 %v40_v11, %v37_v10  ;;  %v38_v15 = vld [vmem:[%s1069_s1 + $0x40] sm:$0xff]  ;;  %v41_v16 = vld [vmem:[%s1069_s1 + $0x58] sm:$0xff] }
   0x5   :  { %626 = vmatpush1.bf16.msra.mxu0 %v625_v8  ;;  %656 = vmatprep.subr.bf16.mxu1 %v655_v9  ;;  %v629_v17 = vpack.c.bf16 %v39_v14, %v36_v12  ;;  %v659_v18 = vpack.c.bf16 %v41_v16, %v38_v15  ;;  %v43_v19 = vld [vmem:[%s1069_s1 + $0x68] sm:$0xff]  ;;  %v46_v20 = vld [vmem:[%s1069_s1 + $0x80] sm:$0xff]  ;;  %v45_v23 = vld [vmem:[%s1069_s1 + $0x78] sm:$0xff] }
   0x6   :  { %v42_v21 = vld [vmem:[%s1069_s1 + $0x60] sm:$0xff]  ;;  %658 = vmatpush3.bf16.msra.mxu1 %v655_v9  ;;  %628 = vmatprep.subr.bf16.mxu0 %v627_v13  ;;  %v631_v22 = vpack.c.bf16 %v46_v20, %v43_v19  ;;  %v44_v24 = vld [vmem:[%s1069_s1 + $0x70] sm:$0xff]  ;;  %v47_v25 = vld [vmem:[%s1069_s1 + $0x88] sm:$0xff] }
   0x7   :  { %660 = vmatprep.subr.bf16.mxu1 %v659_v18  ;;  %v663_v26 = vpack.c.bf16 %v47_v25, %v44_v24  ;;  %v49_v27 = vld [vmem:[%s1069_s1 + $0x98] sm:$0xff]  ;;  %v52_v28 = vld [vmem:[%s1069_s1 + $0xb0] sm:$0xff]  ;;  %v50_v29 = vld [vmem:[%s1069_s1 + $0xa0] sm:$0xff]  ;;  %v633_v31 = vpack.c.bf16 %v45_v23, %v42_v21 }
   0x8   :  { %v53_v30 = vld [vmem:[%s1069_s1 + $0xb8] sm:$0xff]  ;;  %v635_v32 = vpack.c.bf16 %v52_v28, %v49_v27  ;;  %v48_v33 = vld [vmem:[%s1069_s1 + $0x90] sm:$0xff]  ;;  %v51_v34 = vld [vmem:[%s1069_s1 + $0xa8] sm:$0xff] }
   0x9   :  { %630 = vmatpush1.bf16.msra.mxu0 %v629_v17  ;;  %v667_v35 = vpack.c.bf16 %v53_v30, %v50_v29  ;;  %v55_v36 = vld [vmem:[%s1069_s1 + $0xc8] sm:$0xff]  ;;  %v58_v37 = vld [vmem:[%s1069_s1 + $0xe0] sm:$0xff]  ;;  %v56_v38 = vld [vmem:[%s1069_s1 + $0xd0] sm:$0xff]  ;;  %v637_v40 = vpack.c.bf16 %v51_v34, %v48_v33 }
   0xa   :  { %662 = vmatpush3.bf16.msra.mxu1 %v659_v18  ;;  %632 = vmatprep.subr.bf16.mxu0 %v631_v22  ;;  %v59_v39 = vld [vmem:[%s1069_s1 + $0xe8] sm:$0xff]  ;;  %v639_v41 = vpack.c.bf16 %v58_v37, %v55_v36  ;;  %v54_v42 = vld [vmem:[%s1069_s1 + $0xc0] sm:$0xff]  ;;  %v57_v43 = vld [vmem:[%s1069_s1 + $0xd8] sm:$0xff] }
   0xb   :  { %664 = vmatprep.subr.bf16.mxu1 %v663_v26  ;;  %v671_v44 = vpack.c.bf16 %v59_v39, %v56_v38  ;;  %v61_v45 = vld [vmem:[%s1069_s1 + $0xf8] sm:$0xff]  ;;  %v64_v46 = vld [vmem:[%s1069_s1 + $0x110] sm:$0xff]  ;;  %v62_v47 = vld [vmem:[%s1069_s1 + $0x100] sm:$0xff]  ;;  %v641_v49 = vpack.c.bf16 %v57_v43, %v54_v42 }
   0xc   :  { %v65_v48 = vld [vmem:[%s1069_s1 + $0x118] sm:$0xff]  ;;  %v28_v50 = vld [vmem:[%s1070_s0] sm:$0xff]  ;;  %v643_v51 = vpack.c.bf16 %v64_v46, %v61_v45  ;;  %v60_v52 = vld [vmem:[%s1069_s1 + $0xf0] sm:$0xff] }
   0xd   :  { %634 = vmatpush1.bf16.msra.mxu0 %v633_v31  ;;  %v63_v53 = vld [vmem:[%s1069_s1 + $0x108] sm:$0xff]  ;;  %v675_v54 = vpack.c.bf16 %v65_v48, %v62_v47  ;;  %v70_v56 = vld [vmem:[%s1069_s1 + $0x140] sm:$0xff]  ;;  %605 = vmatprep.mubr.f32.mxu1 %v28_v50  ;;  %v68_v57 = vld [vmem:[%s1069_s1 + $0x130] sm:$0xff] }
   0xe   :  { %666 = vmatpush3.bf16.msra.mxu1 %v663_v26  ;;  %636 = vmatprep.subr.bf16.mxu0 %v635_v32  ;;  %v67_v55 = vld [vmem:[%s1069_s1 + $0x128] sm:$0xff]  ;;  %v645_v59 = vpack.c.bf16 %v63_v53, %v60_v52  ;;  %v66_v61 = vld [vmem:[%s1069_s1 + $0x120] sm:$0xff]  ;;  %v69_v62 = vld [vmem:[%s1069_s1 + $0x138] sm:$0xff] }
   0xf   :  { %668 = vmatprep.subr.bf16.mxu1 %v667_v35  ;;  %v71_v58 = vld [vmem:[%s1069_s1 + $0x148] sm:$0xff]  ;;  %v647_v60 = vpack.c.bf16 %v70_v56, %v67_v55  ;;  %v73_v0 = vld [vmem:[%s1069_s1 + $0x158] sm:$0xff]  ;;  %v76_v1 = vld [vmem:[%s1069_s1 + $0x170] sm:$0xff]  ;;  %v649_v5 = vpack.c.bf16 %v69_v62, %v66_v61 }
  0x10   :  { %v679_v63 = vpack.c.bf16 %v71_v58, %v68_v57  ;;  %v74_v2 = vld [vmem:[%s1069_s1 + $0x160] sm:$0xff]  ;;  %v77_v4 = vld [vmem:[%s1069_s1 + $0x178] sm:$0xff]  ;;  %v651_v6 = vpack.c.bf16 %v76_v1, %v73_v0  ;;  %v72_v7 = vld [vmem:[%s1069_s1 + $0x150] sm:$0xff] }
  0x11   :  { %638 = vmatpush1.bf16.msra.mxu0 %v637_v40  ;;  %v75_v8 = vld [vmem:[%s1069_s1 + $0x168] sm:$0xff]  ;;  %v683_v9 = vpack.c.bf16 %v77_v4, %v74_v2  ;;  %v269_v10 = vld [vmem:[%s1071_s3 + $0x80] sm:$0xff]  ;;  %v271_v19 = vld [vmem:[%s1071_s3 + $0x90] sm:$0xff] }
  0x12   :  { %670 = vmatpush3.bf16.msra.mxu1 %v667_v35  ;;  %640 = vmatprep.subr.bf16.mxu0 %v639_v41  ;;  %v270_v11 = vld [vmem:[%s1071_s3 + $0x88] sm:$0xff]  ;;  %v285_v12 = vld [vmem:[%s1071_s3 + $0x100] sm:$0xff]  ;;  %v653_v14 = vpack.c.bf16 %v75_v8, %v72_v7  ;;  %v272_v20 = vld [vmem:[%s1071_s3 + $0x98] sm:$0xff] }
  0x13   :  { %672 = vmatprep.subr.bf16.mxu1 %v671_v44  ;;  %v286_v13 = vld [vmem:[%s1071_s3 + $0x108] sm:$0xff]  ;;  %v687_v15 = vpack.c.bf16 %v270_v11, %v269_v10  ;;  %v253_v16 = vld [vmem:[%s1071_s3] sm:$0xff]  ;;  %v691_v23 = vpack.c.bf16 %v272_v20, %v271_v19  ;;  %v255_v24 = vld [vmem:[%s1071_s3 + $0x10] sm:$0xff] }
  0x14   :  { %v254_v17 = vld [vmem:[%s1071_s3 + $0x8] sm:$0xff]  ;;  %v719_v18 = vpack.c.bf16 %v286_v13, %v285_v12  ;;  %v256_v25 = vld [vmem:[%s1071_s3 + $0x18] sm:$0xff]  ;;  %v273_v26 = vld [vmem:[%s1071_s3 + $0xa0] sm:$0xff] }
  0x15   :  { %642 = vmatpush1.bf16.msra.mxu0 %v641_v49  ;;  %v29_v21 = vld [vmem:[%s1070_s0 + $0x8] sm:$0xff]  ;;  %v689_v22 = vpack.c.bf16 %v254_v17, %v253_v16  ;;  %v693_v28 = vpack.c.bf16 %v256_v25, %v255_v24  ;;  %v257_v30 = vld [vmem:[%s1071_s3 + $0x20] sm:$0xff]  ;;  %v275_v32 = vld [vmem:[%s1071_s3 + $0xb0] sm:$0xff] }
  0x16   :  { %674 = vmatpush3.bf16.msra.mxu1 %v671_v44  ;;  %644 = vmatprep.subr.bf16.mxu0 %v643_v51  ;;  %v274_v27 = vld [vmem:[%s1071_s3 + $0xa8] sm:$0xff]  ;;  %v259_v35 = vld [vmem:[%s1071_s3 + $0x30] sm:$0xff]  ;;  %v260_v36 = vld [vmem:[%s1071_s3 + $0x38] sm:$0xff] }
  0x17   :  { %676 = vmatprep.subr.bf16.mxu1 %v675_v54  ;;  %v695_v29 = vpack.c.bf16 %v274_v27, %v273_v26  ;;  %v258_v31 = vld [vmem:[%s1071_s3 + $0x28] sm:$0xff]  ;;  %v277_v37 = vld [vmem:[%s1071_s3 + $0xc0] sm:$0xff]  ;;  %v701_v39 = vpack.c.bf16 %v260_v36, %v259_v35  ;;  %v279_v43 = vld [vmem:[%s1071_s3 + $0xd0] sm:$0xff] }
  0x18   :  { %v697_v33 = vpack.c.bf16 %v258_v31, %v257_v30  ;;  %v278_v38 = vld [vmem:[%s1071_s3 + $0xc8] sm:$0xff]  ;;  %v261_v41 = vld [vmem:[%s1071_s3 + $0x40] sm:$0xff]  ;;  %v280_v44 = vld [vmem:[%s1071_s3 + $0xd8] sm:$0xff] }
  0x19   :  { %646 = vmatpush1.bf16.msra.mxu0 %v645_v59  ;;  %v703_v40 = vpack.c.bf16 %v278_v38, %v277_v37  ;;  %v262_v42 = vld [vmem:[%s1071_s3 + $0x48] sm:$0xff]  ;;  %v707_v46 = vpack.c.bf16 %v280_v44, %v279_v43  ;;  %v263_v47 = vld [vmem:[%s1071_s3 + $0x50] sm:$0xff]  ;;  %v264_v48 = vld [vmem:[%s1071_s3 + $0x58] sm:$0xff] }
  0x1a   :  { %678 = vmatpush3.bf16.msra.mxu1 %v675_v54  ;;  %648 = vmatprep.subr.bf16.mxu0 %v647_v60  ;;  %v705_v45 = vpack.c.bf16 %v262_v42, %v261_v41  ;;  %v281_v49 = vld [vmem:[%s1071_s3 + $0xe0] sm:$0xff]  ;;  %v709_v51 = vpack.c.bf16 %v264_v48, %v263_v47  ;;  %v266_v54 = vld [vmem:[%s1071_s3 + $0x68] sm:$0xff]  ;;  %v287_v55 = vld [vmem:[%s1071_s3 + $0x110] sm:$0xff] }
  0x1b   :  { %680 = vmatprep.subr.bf16.mxu1 %v679_v63  ;;  %v265_v53 = vld [vmem:[%s1071_s3 + $0x60] sm:$0xff]  ;;  %v288_v57 = vld [vmem:[%s1071_s3 + $0x118] sm:$0xff]  ;;  %v283_v59 = vld [vmem:[%s1071_s3 + $0xf0] sm:$0xff] }
  0x1c   :  { %v713_v56 = vpack.c.bf16 %v266_v54, %v265_v53  ;;  %v723_v58 = vpack.c.bf16 %v288_v57, %v287_v55  ;;  %v284_v60 = vld [vmem:[%s1071_s3 + $0xf8] sm:$0xff]  ;;  %v267_v62 = vld [vmem:[%s1071_s3 + $0x70] sm:$0xff]  ;;  %v289_v0 = vld [vmem:[%s1071_s3 + $0x120] sm:$0xff] }
  0x1d   :  { %650 = vmatpush1.bf16.msra.mxu0 %v649_v5  ;;  %v715_v61 = vpack.c.bf16 %v284_v60, %v283_v59  ;;  %v290_v2 = vld [vmem:[%s1071_s3 + $0x128] sm:$0xf]  ;;  %vm728_vm2 = vmpackc.low %vm305_vm0, %vm744_vm1  ;;  %v80_v5 = vlaneseq  ;;  %v78_v8 = vld [vmem:[%s1072_s2] sm:$0x7] }
  0x1e   :  { %682 = vmatpush3.bf16.msra.mxu1 %v679_v63  ;;  %652 = vmatprep.subr.bf16.mxu0 %v651_v6  ;;  %v268_v63 = vld [vmem:[%s1071_s3 + $0x78] sm:$0xff]  ;;  %v727_v4 = vpack.c.bf16 %v290_v2, %v289_v0  ;;  %v503_v35 = vld [vmem:[%s1074_s4] ss:$0 sm:$0xff] }
  0x1f   :  { %684 = vmatprep.subr.bf16.mxu1 %v683_v9  ;;  %v717_v1 = vpack.c.bf16 %v268_v63, %v267_v62  ;;  %v81_v6 = vshrl.u32 %v80_v5, 7  ;;  %v507_v43 = vld [vmem:[%s1075_s5] ss:$0 sm:$0xff] }
  0x21   :  { %654 = vmatpush1.bf16.msra.mxu0 %v653_v14  ;;  %v82_v7 = vsub.s32 0, %v81_v6  ;;  %v90_v10 = vsub.s32 2, %v81_v6 }
  0x22   :  { %686 = vmatpush3.bf16.msra.mxu1 %v683_v9  ;;  %688 = vmatprep.subr.bf16.mxu0 %v687_v15  ;;  %v86_v9 = vsub.s32 1, %v81_v6 }
  0x23   :  { %720 = vmatprep.subr.bf16.mxu1 %v719_v18  ;;  %v83_v11 = vrot.slane %v78_v8, %v82_v7  ;;  %v91_v13 = vrot.slane %v78_v8, %v90_v10 }
  0x24   :  { %160 = vmatmul.mubr.f32.vlgmr.msra.gmra.mrb[0].mxu0 %v28_v50  ;;  %v282_v50 = vld [vmem:[%s1071_s3 + $0xe8] sm:$0xff]  ;;  %v87_v12 = vrot.slane %v78_v8, %v86_v9 }
  0x25   :  { %606 = vmatmul.mubr.f32.vlgmr.msra.gmra.mrb[0].mxu1 %v29_v21  ;;  %165 = vmatprep.mubr.f32.mxu0 %v743_v3  ;;  %v276_v3 = vld [vmem:[%s1071_s3 + $0xb8] sm:$0xff]  ;;  %v711_v52 = vpack.c.bf16 %v282_v50, %v281_v49 }
  0x26   :  { %690 = vmatpush3.bf16.msra.mxu0 %v689_v22  ;;  %722 = vmatpush3.bf16.msra.mxu1 %v719_v18  ;;  %v699_v34 = vpack.c.bf16 %v276_v3, %v275_v32  ;;  %v12_v32 = vstv %s1073_s6 }
  0x27   :  { %692 = vmatprep.subr.bf16.mxu0 %v691_v23  ;;  %724 = vmatprep.subr.bf16.mxu1 %v723_v58  ;;  %13 = vst [vmem:[#allocation2] sm:$0x1] %v12_v32 }
  0x28   :  { %166 = vmatmul.mubr.f32.gmra.mrb[2].mxu0 %v29_v21 }
  0x2a   :  { %694 = vmatpush3.bf16.msra.mxu0 %v693_v28  ;;  %726 = vmatpush3.bf16.msra.mxu1 %v723_v58 }
  0x2b   :  { %696 = vmatprep.subr.bf16.mxu0 %v695_v29  ;;  %729 = vmatprep.subr.msk.bf16.mxu1 %vm728_vm2, %v727_v4 }
  0x2e   :  { %698 = vmatpush3.bf16.msra.mxu0 %v697_v33  ;;  %732 = vmatpush3.bf16.msk.msra.mxu1 %vm728_vm2, %v727_v4 }
  0x2f   :  { %700 = vmatprep.subr.bf16.mxu0 %v699_v34 }
  0x32   :  { %702 = vmatpush3.bf16.msra.mxu0 %v701_v39 }
  0x33   :  { %704 = vmatprep.subr.bf16.mxu0 %v703_v40 }
  0x36   :  { %706 = vmatpush3.bf16.msra.mxu0 %v705_v45 }
  0x37   :  { %708 = vmatprep.subr.bf16.mxu0 %v707_v46 }
  0x3a   :  { %710 = vmatpush3.bf16.msra.mxu0 %v709_v51 }
  0x3b   :  { %712 = vmatprep.subr.bf16.mxu0 %v711_v52  ;;  %v508_v52 = vld [vmem:[#allocation2] ss:$0 sm:$0xff] }
  0x3e   :  { %714 = vmatpush3.bf16.msra.mxu0 %v713_v56 }
  0x3f   :  { %716 = vmatprep.subr.bf16.mxu0 %v715_v61 }
  0x42   :  { %718 = vmatpush3.bf16.msra.mxu0 %v717_v1 }
  0xf7   :  { %v161_v14 = vpop.f32.mrb[0].mxu0 }
  0xf8   :  { %v162_v15 = vadd.f32 %v161_v14, %v83_v11  ;;  %v163_v16 = vpop.f32.mrb[1].mxu0  ;;  %v607_v17 = vpop.f32.mrb[0].mxu1 }
  0xf9   :  { %v164_v18 = vadd.f32 %v163_v16, %v87_v12  ;;  %v244_v19 = vadd.f32 %v607_v17, %v91_v13  ;;  %v238_v20 = vpop.f32.mrb[1].mxu1 }
  0xfa   :  { %v239_v21 = vadd.f32 %v238_v20, %v91_v13  ;;  %v247_v25 = vmax.f32 %v162_v15, 0.0 }
  0xfb   :  { %v248_v22 = vmax.f32 %v164_v18, 0.0  ;;  %v252_v23 = vmax.f32 %v244_v19, 0.0  ;;  %v167_v24 = vpop.f32.mrb[2].mxu0 }
  0xfc   :  { %v249_v26 = vmax.f32 %v239_v21, 0.0  ;;  %v168_v27 = vadd.f32 %v167_v24, %v83_v11  ;;  %v169_v28 = vpop.f32.mrb[3].mxu0 }
  0xfd   :  { %v170_v29 = vadd.f32 %v169_v28, %v87_v12  ;;  %373 = vmatprep.mubr.f32.mxu0 %v248_v22 }
  0xfe   :  { %374 = vmatmul.mubr.f32.vlgmr.msra.gmra.mrb[4].mxu0 %v247_v25  ;;  %620 = vmatprep.mubr.msk.f32.mxu1 %vm298_vm3, %v249_v26  ;;  %v250_v31 = vmax.f32 %v168_v27, 0.0 }
  0xff   :  { %v251_v30 = vmax.f32 %v170_v29, 0.0  ;;  %621 = vmatmul.mubr.msk.f32.vlgmr.msra.gmra.mrb[2].mxu1 %vm298_vm3, %v252_v23 }
 0x101   :  { %378 = vmatprep.mubr.f32.mxu0 %v251_v30 }
 0x102   :  { %379 = vmatmul.mubr.f32.gmra.mrb[6].mxu0 %v250_v31 }
 0x1d1   :  { %v559_v3 = vpop.f32.mrb[4].mxu0 }
 0x1d2   :  { %v560_v33 = vpop.f32.mrb[5].mxu0  ;;  %v622_v34 = vpop.f32.mrb[2].mxu1 }
 0x1d3   :  { %v561_v36 = vadd.f32 %v560_v33, %v559_v3  ;;  %v450_v37 = vpop.f32.mrb[3].mxu1 }
 0x1d5   :  { %v376_v38 = vadd.f32 %v561_v36, %v503_v35  ;;  %v562_v39 = vpop.f32.mrb[6].mxu0 }
 0x1d6   :  { %v563_v40 = vpop.f32.mrb[7].mxu0 }
 0x1d7   :  { %v451_v41 = vadd.f32 %v450_v37, %v376_v38  ;;  %v564_v42 = vadd.f32 %v563_v40, %v562_v39 }
 0x1d9   :  { %v459_v44 = vmax.f32 %v451_v41, 0.0  ;;  %v381_v45 = vadd.f32 %v564_v42, %v503_v35 }
 0x1db   :  { %v456_v46 = vadd.f32 %v622_v34, %v381_v45  ;;  %v468_v47 = vmul.f32 %v507_v43, %v459_v44 }
 0x1dd   :  { %v471_v48 = vsel %vm470_vm4, %v468_v47, 0.0  ;;  %v460_v49 = vmax.f32 %v456_v46, 0.0 }
 0x1de   :  { %472 = vadd.xlane.f32.xlu0 %v471_v48 }
 0x1df   :  { %v469_v50 = vmul.f32 %v507_v43, %v460_v49 }
 0x1e1   :  { %v474_v51 = vsel %vm470_vm4, %v469_v50, 0.0 }
 0x1e2   :  { %475 = vadd.xlane.f32.xlu0 %v474_v51 }
 0x26b   :  { %v473_v53 = vpop.xlane.xlu0 %472 }
 0x26c   :  { %v484_v54 = vadd.f32 %v508_v52, %v473_v53 }
 0x26e   :  { %v486_v55 = vsub.f32 0.0, %v484_v54 }
 0x26f   :  { %v476_v56 = vpop.xlane.xlu0 %475 }
 0x270   :  { %v488_v57 = vmul.f32 1.442695, %v486_v55  ;;  %v485_v58 = vadd.f32 %v508_v52, %v476_v56 }
 0x272   :  { %735 = vpow2.f32 %v488_v57  ;;  %v487_v59 = vsub.f32 0.0, %v485_v58 }
 0x274   :  { %v490_v60 = vmul.f32 1.442695, %v487_v59 }
 0x276   :  { %737 = vpow2.f32 %v490_v60 }
 0x27c   :  { %v736_v61 = vpop.eup %735 }
 0x27d   :  { %v492_v62 = vadd.f32 1.0, %v736_v61 }
 0x27f   :  { %739 = vrcp.f32 %v492_v62 }
 0x280   :  { %v738_v63 = vpop.eup %737 }
 0x281   :  { %v493_v0 = vadd.f32 1.0, %v738_v63 }
 0x283   :  { %741 = vrcp.f32 %v493_v0 }
 0x289   :  { %v740_v1 = vpop.eup %739 }
 0x28a   :  { %497 = vst.msk [vmem:[%s1076_s7] sm:$0xff] %vm496_vm5, %v740_v1 }
 0x28d   :  { %v742_v2 = vpop.eup %741 }
 0x28e   :  { %498 = vst.msk [vmem:[%s1076_s7 + $0x8] sm:$0xff] %vm496_vm5, %v742_v2 }

</bundles_post_ra>
